<compile_context>
chip_gen: v6e
topology: v6e:2x2x1
jax: 0.10.0
libtpu: 0.0.40
codegen_flags: <defaults>
</compile_context>

<pallas_src>
import jax
import jax.numpy as jnp
from jax.experimental import pallas as pl
from jax.experimental.pallas import tpu as pltpu

_EPS = 1e-8
_LANES = 512              # slab width; blocks always cover the full width
_TARGET_TILE_ROWS = 1024  # 1024 x 512 f32 = 2 MiB per input block
_NUM_SHARDS = 2           # leading "parallel" axis (both TCs on v7x)


def _cdiv(a, b):
    return -(-a // b)


def _round_up(x, m):
    return _cdiv(x, m) * m


def _mape_partial_kernel(pred_ref, tgt_ref, out_ref):
    # out_ref: (1, 8, _LANES) f32 partial-sum accumulator; its block index only
    # depends on the leading ("parallel") grid axis, so it stays resident in
    # VMEM across the inner ("arbitrary") reduction axis.
    @pl.when(pl.program_id(1) == 0)
    def _():
        out_ref[...] = jnp.zeros_like(out_ref)

    p = pred_ref[...].astype(jnp.float32)
    t = tgt_ref[...].astype(jnp.float32)
    err = jnp.abs((t - p) / (t + jnp.float32(_EPS)))

    tr, lanes = err.shape
    # (tr, L) -> (tr//8, 8, L) is a free reshape (aligned with sublane tiling);
    # the axis-0 sum is plain vreg adds on the VPU.
    partial = jnp.sum(err.reshape(tr // 8, 8, lanes), axis=0)   # (8, L)
    out_ref[...] += partial[None]


def mape_loss(predicted, target):
    """MAPE loss via Pallas TPU kernel. Returns a float32 scalar."""
    assert predicted.shape == target.shape
    n = int(predicted.size)
    assert n > 0

    # --- choose tiling (always multiples of 8 rows, full 512-lane width) ---
    rows_needed = _cdiv(n, _LANES)
    rows_min = max(8, _round_up(rows_needed, 8))
    tr = min(_TARGET_TILE_ROWS, rows_min)                     # multiple of 8
    rows_per_shard = max(tr, _round_up(_cdiv(rows_min, _NUM_SHARDS), tr))
    inner_blocks = rows_per_shard // tr
    padded_rows = _NUM_SHARDS * rows_per_shard
    padded_n = padded_rows * _LANES

    # --- flatten + zero-pad (|(0-0)/(0+eps)| == 0, so padding adds nothing) ---
    p_flat = predicted.reshape(-1)
    t_flat = target.reshape(-1)
    if padded_n != n:
        p_flat = jnp.pad(p_flat, (0, padded_n - n))
        t_flat = jnp.pad(t_flat, (0, padded_n - n))
    p2 = p_flat.reshape(padded_rows, _LANES)
    t2 = t_flat.reshape(padded_rows, _LANES)

    in_map = lambda c, i: (c * inner_blocks + i, 0)

    itemsize = jnp.dtype(p2.dtype).itemsize
    cost = pl.CostEstimate(
        flops=3 * padded_n,
        transcendentals=0,
        bytes_accessed=2 * padded_n * itemsize + _NUM_SHARDS * 8 * _LANES * 4,
    )

    partials = pl.pallas_call(
        _mape_partial_kernel,
        out_shape=jax.ShapeDtypeStruct((_NUM_SHARDS, 8, _LANES), jnp.float32),
        grid_spec=pltpu.PrefetchScalarGridSpec(
            num_scalar_prefetch=0,
            grid=(_NUM_SHARDS, inner_blocks),
            in_specs=[
                pl.BlockSpec((tr, _LANES), in_map),
                pl.BlockSpec((tr, _LANES), in_map),
            ],
            out_specs=pl.BlockSpec((1, 8, _LANES), lambda c, i: (c, 0, 0)),
        ),
        compiler_params=pltpu.CompilerParams(
            dimension_semantics=("parallel", "arbitrary"),
            # 2 inputs x 2 pipeline buffers x <=2 MiB blocks + partial outputs.
            vmem_limit_bytes=32 * 1024 * 1024,
        ),
        cost_estimate=cost,
    )(p2, t2)

    # Single tiny cross-lane reduce (2*8*512 partials) + mean in the wrapper.
    # NOTE: denominator is (target + eps), matching the PyTorch reference
    # exactly (not |target| + eps).
    return jnp.sum(partials) / jnp.float32(n)


if __name__ == "__main__":
    key = jax.random.PRNGKey(0)
    k1, k2 = jax.random.split(key)
    shape = (2, 4, 16, 16)  # B, C, H, W (NCHW like PyTorch)
    predicted = jax.random.normal(k1, shape, dtype=jnp.float32)
    # keep target away from zero so the reference is numerically stable
    target = jax.random.normal(k2, shape, dtype=jnp.float32) + 3.0

    loss = mape_loss(predicted, target)
    loss = jax.block_until_ready(loss)

    ref = jnp.mean(jnp.abs((target - predicted) / (target + _EPS)))
    assert jnp.allclose(loss, ref, rtol=1e-5, atol=1e-6), (loss, ref)
    print("KERNEL_OK")
</pallas_src>

<mosaic_0001>
module attributes {stable_mosaic.version = 11 : i64} {
  func.func @_mape_partial_kernel(%arg0: i32, %arg1: i32, %arg2: memref<8x512xf32, #tpu.memory_space<vmem>>, %arg3: memref<8x512xf32, #tpu.memory_space<vmem>>, %arg4: memref<1x8x512xf32, #tpu.memory_space<vmem>>) attributes {dimension_semantics = [#tpu.dimension_semantics<parallel>, #tpu.dimension_semantics<arbitrary>], iteration_bounds = array<i64: 2, 1>, scalar_prefetch = 0 : i64, scratch_operands = 0 : i64, tpu.core_type = #tpu.core_type<tc>, window_params = [{transform_indices = @transform_0, window_bounds = array<i64: 8, 512>}, {transform_indices = @transform_1, window_bounds = array<i64: 8, 512>}, {transform_indices = @transform_2, window_bounds = array<i64: 1, 8, 512>}]} {
    %c0_i32 = arith.constant 0 : i32
    %0 = arith.cmpi eq, %arg1, %c0_i32 : i32
    %1 = arith.extui %0 : i1 to i32
    %c0_i32_0 = arith.constant 0 : i32
    %2 = arith.cmpi ne, %1, %c0_i32_0 : i32
    scf.if %2 {
      %cst_11 = arith.constant 0.000000e+00 : f32
      %16 = vector.broadcast %cst_11 : f32 to vector<1x8x512xf32>
      %c0_12 = arith.constant 0 : index
      %c0_13 = arith.constant 0 : index
      %c0_14 = arith.constant 0 : index
      %17 = vector.load %arg4[%c0_12, %c0_13, %c0_14] : memref<1x8x512xf32, #tpu.memory_space<vmem>>, vector<1x8x512xf32>
      tpu.vector_store %arg4[%c0_12, %c0_13, %c0_14], %16 {strides = array<i32>} : memref<1x8x512xf32, #tpu.memory_space<vmem>>, vector<1x8x512xf32>,
    } else {
    }
    %c0 = arith.constant 0 : index
    %c0_1 = arith.constant 0 : index
    %3 = vector.load %arg2[%c0, %c0_1] : memref<8x512xf32, #tpu.memory_space<vmem>>, vector<8x512xf32>
    %c0_2 = arith.constant 0 : index
    %c0_3 = arith.constant 0 : index
    %4 = vector.load %arg3[%c0_2, %c0_3] : memref<8x512xf32, #tpu.memory_space<vmem>>, vector<8x512xf32>
    %5 = arith.subf %4, %3 : vector<8x512xf32>
    %cst = arith.constant 9.99999993E-9 : f32
    %6 = vector.broadcast %cst : f32 to vector<8x512xf32>
    %7 = arith.addf %4, %6 : vector<8x512xf32>
    %8 = arith.divf %5, %7 : vector<8x512xf32>
    %9 = math.absf %8 : vector<8x512xf32>
    %10 = vector.shape_cast %9 : vector<8x512xf32> to vector<1x8x512xf32>
    %cst_4 = arith.constant dense<0.000000e+00> : vector<8x512xf32>
    %11 = vector.multi_reduction <add>, %10, %cst_4 [0] : vector<1x8x512xf32> to vector<8x512xf32>
    %c0_5 = arith.constant 0 : index
    %c0_6 = arith.constant 0 : index
    %c0_7 = arith.constant 0 : index
    %12 = vector.load %arg4[%c0_5, %c0_6, %c0_7] : memref<1x8x512xf32, #tpu.memory_space<vmem>>, vector<1x8x512xf32>
    %13 = vector.shape_cast %11 : vector<8x512xf32> to vector<1x8x512xf32>
    %14 = arith.addf %12, %13 : vector<1x8x512xf32>
    %c0_8 = arith.constant 0 : index
    %c0_9 = arith.constant 0 : index
    %c0_10 = arith.constant 0 : index
    %15 = vector.load %arg4[%c0_8, %c0_9, %c0_10] : memref<1x8x512xf32, #tpu.memory_space<vmem>>, vector<1x8x512xf32>
    tpu.vector_store %arg4[%c0_8, %c0_9, %c0_10], %14 {strides = array<i32>} : memref<1x8x512xf32, #tpu.memory_space<vmem>>, vector<1x8x512xf32>,
    return
  }
  func.func @transform_0(%arg0: i32, %arg1: i32) -> (i32, i32) {
    %c1_i32 = arith.constant 1 : i32
    %0 = arith.muli %arg0, %c1_i32 : i32
    %1 = arith.addi %0, %arg1 : i32
    %c0_i32 = arith.constant 0 : i32
    %c0_i32_0 = arith.constant 0 : i32
    return %1, %c0_i32 : i32, i32
  }
  func.func @transform_1(%arg0: i32, %arg1: i32) -> (i32, i32) {
    %c1_i32 = arith.constant 1 : i32
    %0 = arith.muli %arg0, %c1_i32 : i32
    %1 = arith.addi %0, %arg1 : i32
    %c0_i32 = arith.constant 0 : i32
    %c0_i32_0 = arith.constant 0 : i32
    return %1, %c0_i32 : i32, i32
  }
  func.func @transform_2(%arg0: i32, %arg1: i32) -> (i32, i32, i32) {
    %c0_i32 = arith.constant 0 : i32
    %c0_i32_0 = arith.constant 0 : i32
    %c0_i32_1 = arith.constant 0 : i32
    return %arg0, %c0_i32, %c0_i32_0 : i32, i32, i32
  }
}

</mosaic_0001>

<bundles_post_ra>
// kernel: tpu_custom_call.1
= control target key start
LH: loop header
LB: loop body
LE: loop exit
PB: predicated region body
PF: predicated region fallthrough
CT: control target
= control target key end

     0   :  { %7 = vsyncpa [#allocation3], 0  ;;  %s818_s0 = inlined_call_operand.hbm [shape: f32[16,512], index: 0, kind: input, shape index: {}]   ;;  %s819_s1 = inlined_call_operand.hbm [shape: f32[16,512], index: 1, kind: input, shape index: {}]   ;;  %s820_s2 = inlined_call_operand.hbm [shape: f32[2,8,512], index: 2, kind: output, shape index: {}]  }
   0x1   :  { %9 = vsyncpa [#allocation3 + $0x1], 0 }
   0x2   :  { %10 = vsyncpa [#allocation6], 0 }
   0x3   :  { %12 = vsyncpa [#allocation6 + $0x1], 0 }
   0x4   :  { %13 = vsyncpa [#allocation4], 0 }
   0x5   :  { %15 = vsyncpa [#allocation4 + $0x1], 0  ;;  %s646_s9 = smov 0   ;;  %s648_s10 = smov 0  }
   0x6   :  { %s650_s11 = smov 0   ;;  %s652_s12 = smov 0  }
   0x7   :  { %s654_s13 = smov 0   ;;  %s656_s14 = smov 0  }
   0x8 LB: > { %s388_s15 = sadd.s32 4294967295, %s626_s14   ;;  %s389_s16 = sadd.s32 4294967294, %s626_s14   ;;  %s626_s14 = sphi %s656_s14, %s21_s14   ;;  %s622_s13 = sphi %s654_s13, %s832_s13   ;;  %s618_s12 = sphi %s652_s12, %s831_s12   ;;  %s614_s11 = sphi %s650_s11, %s830_s11   ;;  %s610_s10 = sphi %s648_s10, %s829_s10   ;;  %s606_s9 = sphi %s646_s9, %s828_s9  }
   0x9   : > { %s33_s17 = sadd.s32 1, %s622_s13  ;;  %s42_s18 = sadd.s32 1, %s614_s11 }
   0xa   : > { %p35_p0 = scmp.ge.s32.totalorder %s33_s17, 2  ;;  %p49_p1 = scmp.ne.s32.totalorder %s614_s11, %s610_s10 }
   0xb   : > { %p50_p2 = scmp.eq.s32.totalorder %s626_s14, 0  ;;  %p55_p3 = scmp.ne.s32.totalorder %s610_s10, %s606_s9 }
   0xc   : > { %s834_s17 = smov (%p35_p0, %s33_s17), 0  ;;  %p56_p5 = scmp.eq.s32.totalorder %s388_s15, 0 }
   0xd   : > { %p687_p4 = por %p50_p2, %p49_p1  ;;  %s39_s20 = ssub.s32 %s622_s13, %s834_s17 }
   0xe   : > { %p107_p6 = scmp.eq.s32.totalorder %s388_s15, 1  ;;  %p40_p7 = scmp.eq.s32.totalorder %s39_s20, 0 }
   0xf   : > { %p693_p8 = por %p56_p5, %p55_p3  ;;  %p113_p10 = scmp.eq.s32.totalorder %s389_s16, 1 }
  0x10   : > { %p697_p9 = por %p107_p6, %p49_p1  ;;  %p427_p13 = scmp.lt.s32.totalorder %s626_s14, 2 }
  0x11   : > { %s702_s23 = scalar_select %p40_p7, %s614_s11, %s42_s18  }
  0x12   : > { %p704_p11 = por %p113_p10, %p55_p3  ;;  %s711_s25 = sand.u32 1, %s614_s11  }
  0x13   : > { %s392_s26 = sshll.u32 %s711_s25, 5  ;;  %s407_s27 = sshll.u32 %s622_s13, 9 }
  0x14   : > { %s144_s30 = scalar_lea.hbm %s818_s0, %s407_s27  ;;  %s137_s3 = scalar_lea.vmem [#allocation2], %s392_s26 }
  0x15   : > { %s146_s4 = sshll.u32 %s137_s3, 4  ;;  %p720_p0 = pnand %p427_p13, %p687_p4  ;;  %s147_s4 = int_to_ptr.vmem [resolvable:$true] %s146_s4 }
  0x16   : > { %p398_p1 = scmp.ge.s32.totalorder %s626_s14, 1  ;;  %p171_p2 = scmp.lt.s32.totalorder %s626_s14, 3 }
  0x17   : > { %s134_s6 = scalar_lea.sflag [#allocation3], %s711_s25  ;;  %p488_p3 = pneg %p720_p0 }
  0x18   : > { %s499_s7 = scalar_lea.vmem %s147_s4, 512  ;;  %s628_s8 = smov [#allocation2]  }
  0x19   : > { %p500_p5 = scmp.ne.s32.totalorder %s147_s4, %s499_s7  ;;  %s504_s15 = sshll.u32 %s628_s8, 4  ;;  %s505_s15 = int_to_ptr.vmem [resolvable:$false] %s504_s15 }
  0x1a   : > { %s506_s16 = scalar_lea.vmem %s505_s15, 1024  ;;  %p507_p4 = scmp.lt.s32.totalorder %s147_s4, %s505_s15 }
  0x1b   : > { %p502_p6 = pnand %p500_p5, %p488_p3  ;;  %p508_p10 = scmp.lt.s32.totalorder %s506_s16, %s499_s7 }
  0x1d   : > { %p503_p7 = pneg %p502_p6  ;;  %p509_p13 = por %p508_p10, %p507_p4 }
  0x1f   : > { %p510_p12 = pnand %p509_p13, %p503_p7 }
  0x21   : > { %513 = shalt.err (!%p510_p12)
}
  0x22   : > { %419 = dma.hbm_to_vmem [thread:$0]  (!%p720_p0), %s144_s30, 512, %s147_s4, %s134_s6  }
  0x23   : > { %p738_p5 = pnand %p398_p1, %p171_p2  ;;  %s164_s28 = scalar_lea.hbm %s819_s1, %s407_s27 }
  0x24   : > { %s157_s29 = scalar_lea.vmem [#allocation5], %s392_s26  ;;  %s154_s7 = scalar_lea.sflag [#allocation6], %s711_s25 }
  0x25   : > { %s166_s3 = sshll.u32 %s157_s29, 4  ;;  %s629_s30 = smov [#allocation5]   ;;  %s167_s3 = int_to_ptr.vmem [resolvable:$true] %s166_s3 }
  0x26   : > { %s527_s8 = scalar_lea.vmem %s167_s3, 512  ;;  %s532_s4 = sshll.u32 %s629_s30, 4  ;;  %s533_s4 = int_to_ptr.vmem [resolvable:$false] %s532_s4 }
  0x27   : > { %p528_p12 = scmp.ne.s32.totalorder %s167_s3, %s527_s8  ;;  %s534_s6 = scalar_lea.vmem %s533_s4, 1024 }
  0x28   : > { %p535_p1 = scmp.lt.s32.totalorder %s167_s3, %s533_s4  ;;  %p536_p2 = scmp.lt.s32.totalorder %s534_s6, %s527_s8 }
  0x29   : > { %p530_p6 = pnand %p528_p12, %p488_p3 }
  0x2a   : > { %p537_p4 = por %p536_p2, %p535_p1 }
  0x2b   : > { %p531_p7 = pneg %p530_p6 }
  0x2d   : > { %p538_p10 = pnand %p537_p4, %p531_p7 }
  0x2f   : > { %541 = shalt.err (!%p538_p10)
}
  0x30   : > { %422 = dma.hbm_to_vmem [thread:$0]  (!%p720_p0), %s164_s28, 512, %s167_s3, %s154_s7  }
  0x31   : > { %175 = sbr.rel (%p738_p5) target bundleno = 94 (0x5e), region = 28  ;;  %s754_s25 = sand.u32 (!%p738_p5), 1, %s610_s10  }
  0x32   : > { %s757_s26 = sshll.u32 (!%p738_p5), %s754_s25, 5  ;;  %s178_s27 = scalar_lea.sflag (!%p738_p5), [#allocation3], %s754_s25 }
  0x33   : > { %s181_s15 = scalar_lea.vmem (!%p738_p5), [#allocation2], %s757_s26 }
  0x36   : > { %593 = dma.done.wait (%p693_p8), %s178_s27, 512  }
  0x37   : > { %595 = vsyncadd (%p693_p8), %s178_s27, 4294966784  ;;  %s187_s5 = scalar_lea.sflag [#allocation6], %s754_s25  ;;  %s190_s16 = scalar_lea.vmem [#allocation5], %s757_s26 }
  0x38   : > { %597 = dma.done.wait (%p693_p8), %s187_s5, 512  }
  0x39   : > { %599 = vsyncadd (%p693_p8), %s187_s5, 4294966784  ;;  %v230_v0 = vld [vmem:[%s190_s16] sm:$0xff]  ;;  %v231_v2 = vld [vmem:[%s190_s16 + $0x8] sm:$0xff]  ;;  %s409_s21 = sshll.u32 %s618_s12, 9  ;;  %s215_s18 = scalar_lea.vmem [#allocation7], %s757_s26 }
  0x3a   : > { %v238_v1 = vadd.f32 1e-08, %v230_v0  ;;  %v232_v3 = vld [vmem:[%s190_s16 + $0x10] sm:$0xff]  ;;  %v239_v4 = vadd.f32 1e-08, %v231_v2  ;;  %v233_v6 = vld [vmem:[%s190_s16 + $0x18] sm:$0xff]  ;;  %s776_s29 = scalar_lea.hbm %s820_s2, %s409_s21 }
  0x3b   : > { %v240_v5 = vadd.f32 1e-08, %v232_v3  ;;  %v241_v7 = vadd.f32 1e-08, %v233_v6  ;;  %v226_v8 = vld [vmem:[%s181_s15] sm:$0xff]  ;;  %v227_v9 = vld [vmem:[%s181_s15 + $0x8] sm:$0xff] }
  0x3c   : > { %478 = vrcp.f32 %v238_v1  ;;  %v228_v10 = vld [vmem:[%s181_s15 + $0x10] sm:$0xff]  ;;  %v234_v11 = vsub.f32 %v230_v0, %v226_v8  ;;  %v229_v12 = vld [vmem:[%s181_s15 + $0x18] sm:$0xff]  ;;  %v235_v13 = vsub.f32 %v231_v2, %v227_v9  ;;  %s285_s19 = sshll.u32 %s215_s18, 4  ;;  %s271_s3 = scalar_lea.sflag [#allocation4], %s754_s25  ;;  %s286_s19 = int_to_ptr.vmem [resolvable:$true] %s285_s19 }
  0x3d   : > { %480 = vrcp.f32 %v239_v4  ;;  %v236_v14 = vsub.f32 %v232_v3, %v228_v10  ;;  %v237_v16 = vsub.f32 %v233_v6, %v229_v12  ;;  %s542_s7 = scalar_lea.vmem %s286_s19, 512  ;;  %s630_s12 = smov [#allocation7]  }
  0x3e   : > { %482 = vrcp.f32 %v240_v5  ;;  %p543_p8 = scmp.ne.s32.totalorder %s286_s19, %s542_s7  ;;  %s546_s8 = sshll.u32 %s630_s12, 4  ;;  %s547_s8 = int_to_ptr.vmem [resolvable:$false] %s546_s8 }
  0x3f   : > { %484 = vrcp.f32 %v241_v7  ;;  %s548_s30 = scalar_lea.vmem %s547_s8, 1024  ;;  %p549_p13 = scmp.lt.s32.totalorder %s286_s19, %s547_s8 }
  0x40   : > { %p544_p0 = pnand %p543_p8, %p697_p9  ;;  %p550_p5 = scmp.lt.s32.totalorder %s548_s30, %s542_s7 }
  0x42   : > { %p545_p3 = pneg %p544_p0  ;;  %p551_p12 = por %p550_p5, %p549_p13 }
  0x44   : > { %p552_p6 = pnand %p551_p12, %p545_p3 }
  0x49   : > { %v479_v15 = vpop.eup %478 }
  0x4a   : > { %v481_v17 = vpop.eup %480  ;;  %v243_v18 = vmul.f32 %v479_v15, %v234_v11 }
  0x4b   : > { %v483_v19 = vpop.eup %482  ;;  %v245_v20 = vmul.f32 %v481_v17, %v235_v13 }
  0x4c   : > { %v485_v21 = vpop.eup %484  ;;  %v250_v22 = vand.u32 2147483647, %v243_v18  ;;  %v247_v23 = vmul.f32 %v483_v19, %v236_v14 }
  0x4d   : > { %v251_v24 = vand.u32 2147483647, %v245_v20  ;;  %v249_v25 = vmul.f32 %v485_v21, %v237_v16 }
  0x4e   : > { %v252_v26 = vand.u32 2147483647, %v247_v23  ;;  %266 = vst [vmem:[%s215_s18] sm:$0xff] %v250_v22 }
  0x4f   : > { %v253_v27 = vand.u32 2147483647, %v249_v25  ;;  %267 = vst [vmem:[%s215_s18 + $0x8] sm:$0xff] %v251_v24 }
  0x50   : > { %268 = vst [vmem:[%s215_s18 + $0x10] sm:$0xff] %v252_v26 }
  0x51   : > { %269 = vst [vmem:[%s215_s18 + $0x18] sm:$0xff] %v253_v27 }
  0x52   : > { %555 = shalt.err (!%p552_p6)
}
  0x53   : > { %s556_s4 = scalar_lea.hbm %s776_s29, 512  ;;  %s560_s26 = scalar_lea.hbm %s820_s2, 1024 }
  0x54   : > { %p557_p7 = scmp.ne.s32.totalorder %s776_s29, %s556_s4  ;;  %p561_p4 = scmp.lt.s32.totalorder %s776_s29, %s820_s2 }
  0x55   : > { %p562_p10 = scmp.lt.s32.totalorder %s560_s26, %s556_s4 }
  0x56   : > { %p558_p1 = pnand %p557_p7, %p697_p9 }
  0x57   : > { %p563_p8 = por %p562_p10, %p561_p4 }
  0x58   : > { %p559_p2 = pneg %p558_p1 }
  0x5a   : > { %p564_p0 = pnand %p563_p8, %p559_p2 }
  0x5c   : > { %567 = shalt.err (!%p564_p0)
}
  0x5d   : > { %414 = dma.vmem_to_hbm [thread:$0]  (%p697_p9), %s286_s19, 512, %s776_s29, %s271_s3  }
  0x5e PF: > { %s297_s5 = sand.u32 1, %s606_s9   ;;  %p827_p3 = scmp.ge.s32.totalorder %s626_s14, 2 }
  0x5f   : > { %s298_s16 = scalar_lea.sflag [#allocation4], %s297_s5 }
  0x60   : > { %p424_p13 = pnand %p827_p3, %p704_p11 }
  0x62   : > { %p425_p5 = pneg %p424_p13 }
  0x64   : > { %601 = dma.done.wait (%p425_p5), %s298_s16, 512  }
  0x65   : > { %603 = vsyncadd (%p425_p5), %s298_s16, 4294966784  ;;  %s21_s14 = sadd.s32 1, %s626_s14   ;;  %s828_s9 = smov %s610_s10 }
  0x66   : > { %p18_p12 = scmp.ge.s32.totalorder %s21_s14, 4   ;;  %s829_s10 = smov %s614_s11 }
  0x67   : > { %s830_s11 = smov %s702_s23  ;;  %s831_s12 = smov %s622_s13 }
  0x68   : > { %s832_s13 = smov %s834_s17  ;;  %20 = sbr.rel (!%p18_p12) target bundleno = 8 (0x8), region = 90 }
  0x6d   :  { %303 = vsyncpa [#allocation3], 1 }
  0x6e   :  { %305 = vsyncpa [#allocation3 + $0x1], 1 }
  0x6f   :  { %306 = vsyncpa [#allocation6], 1 }
  0x70   :  { %308 = vsyncpa [#allocation6 + $0x1], 1 }
  0x71   :  { %309 = vsyncpa [#allocation4], 1 }
  0x72   :  { %311 = vsyncpa [#allocation4 + $0x1], 1 }

</bundles_post_ra>
